<compile_context>
chip_gen: v6e
topology: v6e:2x2x1
jax: 0.10.0
libtpu: 0.0.40
codegen_flags: <defaults>
</compile_context>

<pallas_src>
import functools

import jax
import jax.numpy as jnp
from jax.experimental import pallas as pl
from jax.experimental.pallas import tpu as pltpu

SMOOTH = 1e-05

# Budget for double-buffered input blocks (all input arrays, both buffers).
# ~2-3 MiB per block amortizes the ~0.35us per-grid-step overhead and stays
# under the most restrictive scoped-VMEM default (16 MiB on v5e).
_INPUT_VMEM_BUDGET = 12 * 1024 * 1024


def _accumulate(inter_ref, denom_ref, inter_prod, denom_prod, start, d_per_row):
    """Accumulate row-sums of the two products into the resident output block.

    Masks lanes past `d_per_row` for the (possibly partial / phantom) tail tile.
    """
    tile_d = inter_prod.shape[-1]
    is_full = start + tile_d <= d_per_row

    def add(ip, dp):
        inter_ref[...] += jnp.sum(ip, axis=1, keepdims=True)[None]
        denom_ref[...] += jnp.sum(dp, axis=1, keepdims=True)[None]

    @pl.when(is_full)
    def _():
        add(inter_prod, denom_prod)

    @pl.when(jnp.logical_not(is_full))
    def _():
        lane = jax.lax.broadcasted_iota(jnp.int32, inter_prod.shape, 1) + start
        valid = lane < d_per_row
        zero = jnp.zeros_like(inter_prod)
        add(jnp.where(valid, inter_prod, zero), jnp.where(valid, denom_prod, zero))


def _dice_kernel_w(x_ref, t_ref, w_ref, inter_ref, denom_ref, *,
                   d_per_row, tiles_per_core, tile_d):
    k = pl.program_id(1)

    @pl.when(k == 0)
    def _():
        inter_ref[...] = jnp.zeros_like(inter_ref)
        denom_ref[...] = jnp.zeros_like(denom_ref)

    start = (pl.program_id(0) * tiles_per_core + k) * tile_d
    x = x_ref[...].astype(jnp.float32)
    t = t_ref[...].astype(jnp.float32)
    w = w_ref[...].astype(jnp.float32)
    xw = x * w
    # denominator folded: sum(x*w) + sum(t*w) == sum(x*w + t*w)
    _accumulate(inter_ref, denom_ref, xw * t, xw + t * w, start, d_per_row)


def _dice_kernel_nw(x_ref, t_ref, inter_ref, denom_ref, *,
                    d_per_row, tiles_per_core, tile_d):
    k = pl.program_id(1)

    @pl.when(k == 0)
    def _():
        inter_ref[...] = jnp.zeros_like(inter_ref)
        denom_ref[...] = jnp.zeros_like(denom_ref)

    start = (pl.program_id(0) * tiles_per_core + k) * tile_d
    x = x_ref[...].astype(jnp.float32)
    t = t_ref[...].astype(jnp.float32)
    # weights == 1 implicitly: inter = x*t, denom = x + t
    _accumulate(inter_ref, denom_ref, x * t, x + t, start, d_per_row)


@jax.jit
def binary_dice_loss(inputs, targets, weights=None):
    """Matches BinaryDiceLoss.forward(inputs, targets, weights)."""
    n = targets.shape[0]
    d_total = 1
    for dim in targets.shape[1:]:
        d_total *= dim

    # Fill vreg sublanes when N is small: split each sample's row of length D
    # into `row_split` rows (free row-major reshape, no data movement).
    row_split = 1
    if n < 8:
        for cand in (8, 4, 2):
            if d_total % cand == 0:
                row_split = cand
                break
    rows = n * row_split
    d_per_row = d_total // row_split

    has_w = weights is not None
    arrays = [inputs.reshape(rows, d_per_row), targets.reshape(rows, d_per_row)]
    if has_w:
        arrays.append(weights.reshape(rows, d_per_row))
    n_arrays = len(arrays)

    # Tile size: biggest D-tile that keeps double-buffered inputs under budget.
    itemsize = max(a.dtype.itemsize for a in arrays)
    per_block = _INPUT_VMEM_BUDGET // (2 * n_arrays)
    max_lanes = max(128, per_block // max(1, rows * itemsize))
    if d_per_row <= max_lanes:
        tile_d = d_per_row                      # single tile; full-dim block is legal
    else:
        tile_d = (max_lanes // 128) * 128       # lane-aligned tile, tail masked in-kernel
    num_tiles = pl.cdiv(d_per_row, tile_d)

    # Split the reduction across 2 TensorCores (v7x); harmless on 1-TC chips.
    n_cores = 2 if num_tiles >= 2 else 1
    tiles_per_core = pl.cdiv(num_tiles, n_cores)

    def in_map(i, k):
        # Clamp phantom trailing tiles (when num_tiles is odd); the kernel's
        # lane mask zeroes their contribution anyway.
        return (0, jnp.minimum(i * tiles_per_core + k, num_tiles - 1))

    in_spec = pl.BlockSpec((rows, tile_d), in_map)
    out_spec = pl.BlockSpec((1, rows, 1), lambda i, k: (i, 0, 0))
    out_shape = jax.ShapeDtypeStruct((n_cores, rows, 1), jnp.float32)

    kernel = _dice_kernel_w if has_w else _dice_kernel_nw
    kernel = functools.partial(kernel, d_per_row=d_per_row,
                               tiles_per_core=tiles_per_core, tile_d=tile_d)

    inter_parts, denom_parts = pl.pallas_call(
        kernel,
        out_shape=(out_shape, out_shape),
        grid_spec=pltpu.PrefetchScalarGridSpec(
            num_scalar_prefetch=0,
            grid=(n_cores, tiles_per_core),
            in_specs=[in_spec] * n_arrays,
            out_specs=(out_spec, out_spec),
        ),
        compiler_params=pltpu.CompilerParams(
            dimension_semantics=("parallel", "arbitrary"),
            vmem_limit_bytes=32 * 1024 * 1024,
        ),
    )(*arrays)

    # Tiny epilogue: combine core partials, fold the row_split rows back into
    # per-sample sums, form dice and the scalar loss.
    inter = inter_parts.sum(axis=0)[:, 0].reshape(n, row_split).sum(axis=1)
    denom = denom_parts.sum(axis=0)[:, 0].reshape(n, row_split).sum(axis=1)
    dice = (2.0 * inter + SMOOTH) / (denom + SMOOTH)
    return 1.0 - jnp.sum(dice) / n


def _reference(inputs, targets, weights=None):
    if weights is None:
        weights = jnp.ones_like(targets)
    n = targets.shape[0]
    x = inputs.reshape(n, -1).astype(jnp.float32)
    t = targets.reshape(n, -1).astype(jnp.float32)
    w = weights.reshape(n, -1).astype(jnp.float32)
    inter = (x * t * w).sum(1)
    dice = (2.0 * inter + SMOOTH) / ((x * w).sum(1) + (t * w).sum(1) + SMOOTH)
    return 1.0 - dice.sum() / n


if __name__ == "__main__":
    key = jax.random.PRNGKey(0)
    k1, k2, k3 = jax.random.split(key, 3)

    # 1) Small NCHW f32 case, with and without explicit weights.
    N, C, H, W = 2, 4, 16, 16
    inputs = jax.nn.sigmoid(jax.random.normal(k1, (N, C, H, W), jnp.float32))
    targets = (jax.random.uniform(k2, (N, C, H, W)) > 0.5).astype(jnp.float32)
    weights = jax.random.uniform(k3, (N, C, H, W), jnp.float32)

    loss_w = jax.block_until_ready(binary_dice_loss(inputs, targets, weights))
    ref_w = _reference(inputs, targets, weights)
    assert jnp.allclose(loss_w, ref_w, rtol=1e-5, atol=1e-6), (loss_w, ref_w)

    loss_nw = jax.block_until_ready(binary_dice_loss(inputs, targets))
    ref_nw = _reference(inputs, targets)
    assert jnp.allclose(loss_nw, ref_nw, rtol=1e-5, atol=1e-6), (loss_nw, ref_nw)

    # 2) bf16 inputs (cast happens in-kernel, half the DMA bytes), no weights.
    k4, k5 = jax.random.split(k1)
    xb = jax.nn.sigmoid(jax.random.normal(k4, (2, 4, 32, 32), jnp.float32)).astype(jnp.bfloat16)
    tb = (jax.random.uniform(k5, (2, 4, 32, 32)) > 0.5).astype(jnp.bfloat16)
    loss_b = jax.block_until_ready(binary_dice_loss(xb, tb))
    ref_b = _reference(xb, tb)
    assert jnp.allclose(loss_b, ref_b, rtol=1e-4, atol=1e-5), (loss_b, ref_b)

    # 3) Larger f32 case exercising multi-tile reduction, the masked tail tile
    #    and the 2-TensorCore parallel split.
    k6, k7, k8 = jax.random.split(k2, 3)
    shp = (2, 8, 192, 192)
    xl = jax.nn.sigmoid(jax.random.normal(k6, shp, jnp.float32))
    tl = (jax.random.uniform(k7, shp) > 0.5).astype(jnp.float32)
    wl = jax.random.uniform(k8, shp, jnp.float32)
    loss_l = jax.block_until_ready(binary_dice_loss(xl, tl, wl))
    ref_l = _reference(xl, tl, wl)
    assert jnp.allclose(loss_l, ref_l, rtol=1e-4, atol=1e-5), (loss_l, ref_l)

    print("KERNEL_OK")
</pallas_src>

<mosaic_0001>
module attributes {stable_mosaic.version = 11 : i64} {
  func.func @_dice_kernel_w(%arg0: i32, %arg1: i32, %arg2: memref<16x128xf32, #tpu.memory_space<vmem>>, %arg3: memref<16x128xf32, #tpu.memory_space<vmem>>, %arg4: memref<16x128xf32, #tpu.memory_space<vmem>>, %arg5: memref<1x16x1xf32, #tpu.memory_space<vmem>>, %arg6: memref<1x16x1xf32, #tpu.memory_space<vmem>>) attributes {dimension_semantics = [#tpu.dimension_semantics<parallel>, #tpu.dimension_semantics<arbitrary>], iteration_bounds = array<i64: 1, 1>, scalar_prefetch = 0 : i64, scratch_operands = 0 : i64, tpu.core_type = #tpu.core_type<tc>, window_params = [{transform_indices = @transform_0, window_bounds = array<i64: 16, 128>}, {transform_indices = @transform_1, window_bounds = array<i64: 16, 128>}, {transform_indices = @transform_2, window_bounds = array<i64: 16, 128>}, {transform_indices = @transform_3, window_bounds = array<i64: 1, 16, 1>}, {transform_indices = @transform_4, window_bounds = array<i64: 1, 16, 1>}]} {
    %c0_i32 = arith.constant 0 : i32
    %0 = arith.cmpi eq, %arg1, %c0_i32 : i32
    %1 = arith.extui %0 : i1 to i32
    %c0_i32_0 = arith.constant 0 : i32
    %2 = arith.cmpi ne, %1, %c0_i32_0 : i32
    scf.if %2 {
      %cst = arith.constant 0.000000e+00 : f32
      %20 = vector.broadcast %cst : f32 to vector<1x16x1xf32>
      %c0_10 = arith.constant 0 : index
      %c0_11 = arith.constant 0 : index
      %c0_12 = arith.constant 0 : index
      %21 = vector.load %arg5[%c0_10, %c0_11, %c0_12] : memref<1x16x1xf32, #tpu.memory_space<vmem>>, vector<1x16x1xf32>
      tpu.vector_store %arg5[%c0_10, %c0_11, %c0_12], %20 {strides = array<i32>} : memref<1x16x1xf32, #tpu.memory_space<vmem>>, vector<1x16x1xf32>,
      %cst_13 = arith.constant 0.000000e+00 : f32
      %22 = vector.broadcast %cst_13 : f32 to vector<1x16x1xf32>
      %c0_14 = arith.constant 0 : index
      %c0_15 = arith.constant 0 : index
      %c0_16 = arith.constant 0 : index
      %23 = vector.load %arg6[%c0_14, %c0_15, %c0_16] : memref<1x16x1xf32, #tpu.memory_space<vmem>>, vector<1x16x1xf32>
      tpu.vector_store %arg6[%c0_14, %c0_15, %c0_16], %22 {strides = array<i32>} : memref<1x16x1xf32, #tpu.memory_space<vmem>>, vector<1x16x1xf32>,
    } else {
    }
    %c1_i32 = arith.constant 1 : i32
    %3 = arith.muli %arg0, %c1_i32 : i32
    %4 = arith.addi %3, %arg1 : i32
    %c128_i32 = arith.constant 128 : i32
    %5 = arith.muli %4, %c128_i32 : i32
    %c0 = arith.constant 0 : index
    %c0_1 = arith.constant 0 : index
    %6 = vector.load %arg2[%c0, %c0_1] : memref<16x128xf32, #tpu.memory_space<vmem>>, vector<16x128xf32>
    %c0_2 = arith.constant 0 : index
    %c0_3 = arith.constant 0 : index
    %7 = vector.load %arg3[%c0_2, %c0_3] : memref<16x128xf32, #tpu.memory_space<vmem>>, vector<16x128xf32>
    %c0_4 = arith.constant 0 : index
    %c0_5 = arith.constant 0 : index
    %8 = vector.load %arg4[%c0_4, %c0_5] : memref<16x128xf32, #tpu.memory_space<vmem>>, vector<16x128xf32>
    %9 = arith.mulf %6, %8 : vector<16x128xf32>
    %10 = arith.mulf %9, %7 : vector<16x128xf32>
    %11 = arith.mulf %7, %8 : vector<16x128xf32>
    %12 = arith.addf %9, %11 : vector<16x128xf32>
    %c128_i32_6 = arith.constant 128 : i32
    %13 = arith.addi %5, %c128_i32_6 : i32
    %c128_i32_7 = arith.constant 128 : i32
    %14 = arith.cmpi sle, %13, %c128_i32_7 : i32
    %15 = arith.extui %14 : i1 to i32
    %c0_i32_8 = arith.constant 0 : i32
    %16 = arith.cmpi ne, %15, %c0_i32_8 : i32
    scf.if %16 {
      %c0_10 = arith.constant 0 : index
      %c0_11 = arith.constant 0 : index
      %c0_12 = arith.constant 0 : index
      %20 = vector.load %arg5[%c0_10, %c0_11, %c0_12] : memref<1x16x1xf32, #tpu.memory_space<vmem>>, vector<1x16x1xf32>
      %cst = arith.constant dense<0.000000e+00> : vector<16xf32>
      %21 = vector.multi_reduction <add>, %10, %cst [1] : vector<16x128xf32> to vector<16xf32>
      %22 = vector.shape_cast %21 : vector<16xf32> to vector<16x1xf32>
      %23 = vector.shape_cast %22 : vector<16x1xf32> to vector<1x16x1xf32>
      %24 = arith.addf %20, %23 : vector<1x16x1xf32>
      %c0_13 = arith.constant 0 : index
      %c0_14 = arith.constant 0 : index
      %c0_15 = arith.constant 0 : index
      %25 = vector.load %arg5[%c0_13, %c0_14, %c0_15] : memref<1x16x1xf32, #tpu.memory_space<vmem>>, vector<1x16x1xf32>
      tpu.vector_store %arg5[%c0_13, %c0_14, %c0_15], %24 {strides = array<i32>} : memref<1x16x1xf32, #tpu.memory_space<vmem>>, vector<1x16x1xf32>,
      %c0_16 = arith.constant 0 : index
      %c0_17 = arith.constant 0 : index
      %c0_18 = arith.constant 0 : index
      %26 = vector.load %arg6[%c0_16, %c0_17, %c0_18] : memref<1x16x1xf32, #tpu.memory_space<vmem>>, vector<1x16x1xf32>
      %cst_19 = arith.constant dense<0.000000e+00> : vector<16xf32>
      %27 = vector.multi_reduction <add>, %12, %cst_19 [1] : vector<16x128xf32> to vector<16xf32>
      %28 = vector.shape_cast %27 : vector<16xf32> to vector<16x1xf32>
      %29 = vector.shape_cast %28 : vector<16x1xf32> to vector<1x16x1xf32>
      %30 = arith.addf %26, %29 : vector<1x16x1xf32>
      %c0_20 = arith.constant 0 : index
      %c0_21 = arith.constant 0 : index
      %c0_22 = arith.constant 0 : index
      %31 = vector.load %arg6[%c0_20, %c0_21, %c0_22] : memref<1x16x1xf32, #tpu.memory_space<vmem>>, vector<1x16x1xf32>
      tpu.vector_store %arg6[%c0_20, %c0_21, %c0_22], %30 {strides = array<i32>} : memref<1x16x1xf32, #tpu.memory_space<vmem>>, vector<1x16x1xf32>,
    } else {
    }
    %true = arith.constant true
    %17 = arith.xori %14, %true : i1
    %18 = arith.extui %17 : i1 to i32
    %c0_i32_9 = arith.constant 0 : i32
    %19 = arith.cmpi ne, %18, %c0_i32_9 : i32
    scf.if %19 {
      %20 = tpu.iota {dimensions = array<i32: 1>} : vector<16x128xi32>
      %21 = vector.broadcast %5 : i32 to vector<16x128xi32>
      %22 = arith.addi %20, %21 : vector<16x128xi32>
      %c128_i32_10 = arith.constant 128 : i32
      %23 = vector.broadcast %c128_i32_10 : i32 to vector<16x128xi32>
      %24 = arith.cmpi slt, %22, %23 : vector<16x128xi32>
      %cst = arith.constant 0.000000e+00 : f32
      %25 = vector.broadcast %cst : f32 to vector<16x128xf32>
      %26 = arith.select %24, %10, %25 : vector<16x128xi1>, vector<16x128xf32>
      %27 = arith.select %24, %12, %25 : vector<16x128xi1>, vector<16x128xf32>
      %c0_11 = arith.constant 0 : index
      %c0_12 = arith.constant 0 : index
      %c0_13 = arith.constant 0 : index
      %28 = vector.load %arg5[%c0_11, %c0_12, %c0_13] : memref<1x16x1xf32, #tpu.memory_space<vmem>>, vector<1x16x1xf32>
      %cst_14 = arith.constant dense<0.000000e+00> : vector<16xf32>
      %29 = vector.multi_reduction <add>, %26, %cst_14 [1] : vector<16x128xf32> to vector<16xf32>
      %30 = vector.shape_cast %29 : vector<16xf32> to vector<16x1xf32>
      %31 = vector.shape_cast %30 : vector<16x1xf32> to vector<1x16x1xf32>
      %32 = arith.addf %28, %31 : vector<1x16x1xf32>
      %c0_15 = arith.constant 0 : index
      %c0_16 = arith.constant 0 : index
      %c0_17 = arith.constant 0 : index
      %33 = vector.load %arg5[%c0_15, %c0_16, %c0_17] : memref<1x16x1xf32, #tpu.memory_space<vmem>>, vector<1x16x1xf32>
      tpu.vector_store %arg5[%c0_15, %c0_16, %c0_17], %32 {strides = array<i32>} : memref<1x16x1xf32, #tpu.memory_space<vmem>>, vector<1x16x1xf32>,
      %c0_18 = arith.constant 0 : index
      %c0_19 = arith.constant 0 : index
      %c0_20 = arith.constant 0 : index
      %34 = vector.load %arg6[%c0_18, %c0_19, %c0_20] : memref<1x16x1xf32, #tpu.memory_space<vmem>>, vector<1x16x1xf32>
      %cst_21 = arith.constant dense<0.000000e+00> : vector<16xf32>
      %35 = vector.multi_reduction <add>, %27, %cst_21 [1] : vector<16x128xf32> to vector<16xf32>
      %36 = vector.shape_cast %35 : vector<16xf32> to vector<16x1xf32>
      %37 = vector.shape_cast %36 : vector<16x1xf32> to vector<1x16x1xf32>
      %38 = arith.addf %34, %37 : vector<1x16x1xf32>
      %c0_22 = arith.constant 0 : index
      %c0_23 = arith.constant 0 : index
      %c0_24 = arith.constant 0 : index
      %39 = vector.load %arg6[%c0_22, %c0_23, %c0_24] : memref<1x16x1xf32, #tpu.memory_space<vmem>>, vector<1x16x1xf32>
      tpu.vector_store %arg6[%c0_22, %c0_23, %c0_24], %38 {strides = array<i32>} : memref<1x16x1xf32, #tpu.memory_space<vmem>>, vector<1x16x1xf32>,
    } else {
    }
    return
  }
  func.func @transform_0(%arg0: i32, %arg1: i32) -> (i32, i32) {
    %c1_i32 = arith.constant 1 : i32
    %0 = arith.muli %arg0, %c1_i32 : i32
    %1 = arith.addi %0, %arg1 : i32
    %c0_i32 = arith.constant 0 : i32
    %2 = arith.minsi %1, %c0_i32 : i32
    %c0_i32_0 = arith.constant 0 : i32
    %c0_i32_1 = arith.constant 0 : i32
    return %c0_i32_0, %2 : i32, i32
  }
  func.func @transform_1(%arg0: i32, %arg1: i32) -> (i32, i32) {
    %c1_i32 = arith.constant 1 : i32
    %0 = arith.muli %arg0, %c1_i32 : i32
    %1 = arith.addi %0, %arg1 : i32
    %c0_i32 = arith.constant 0 : i32
    %2 = arith.minsi %1, %c0_i32 : i32
    %c0_i32_0 = arith.constant 0 : i32
    %c0_i32_1 = arith.constant 0 : i32
    return %c0_i32_0, %2 : i32, i32
  }
  func.func @transform_2(%arg0: i32, %arg1: i32) -> (i32, i32) {
    %c1_i32 = arith.constant 1 : i32
    %0 = arith.muli %arg0, %c1_i32 : i32
    %1 = arith.addi %0, %arg1 : i32
    %c0_i32 = arith.constant 0 : i32
    %2 = arith.minsi %1, %c0_i32 : i32
    %c0_i32_0 = arith.constant 0 : i32
    %c0_i32_1 = arith.constant 0 : i32
    return %c0_i32_0, %2 : i32, i32
  }
  func.func @transform_3(%arg0: i32, %arg1: i32) -> (i32, i32, i32) {
    %c0_i32 = arith.constant 0 : i32
    %c0_i32_0 = arith.constant 0 : i32
    %c0_i32_1 = arith.constant 0 : i32
    return %arg0, %c0_i32, %c0_i32_0 : i32, i32, i32
  }
  func.func @transform_4(%arg0: i32, %arg1: i32) -> (i32, i32, i32) {
    %c0_i32 = arith.constant 0 : i32
    %c0_i32_0 = arith.constant 0 : i32
    %c0_i32_1 = arith.constant 0 : i32
    return %arg0, %c0_i32, %c0_i32_0 : i32, i32, i32
  }
}

</mosaic_0001>

<bundles_post_ra>
// kernel: squeeze.3
= control target key start
LH: loop header
LB: loop body
LE: loop exit
PB: predicated region body
PF: predicated region fallthrough
CT: control target
= control target key end

     0   :  { %vm8_vm0 = vcmask 64512   ;;  %s42_s0 = inlined_call_operand.vmem [shape: f32[16], index: 0, kind: input, shape index: {}]   ;;  %s43_s1 = inlined_call_operand.vmem [shape: f32[2,8], index: 1, kind: output, shape index: {}]  }
   0x1   :  { %v5_v0 = vld [vmem:[%s42_s0] sm:$0x1]  ;;  %s25_s0 = smov 120  }
   0x2   :  { %6 = vst [vmem:[#allocation1] sm:$0x1] %v5_v0 }
   0x9   :  { %v10_v1 = vld [vmem:[#allocation1] sm:$0x1]  }
   0xa   :  { %v7_v2 = vld [vmem:[#allocation1] sm:$0x1]   ;;  %11 = vrot.lane.b32.xlu0 %v10_v1, %s25_s0 }
   0xb   :  { %9 = vst.msk [vmem:[#allocation0] sm:$0x1] %vm8_vm0, %v7_v2  }
  0x7c   :  { %v12_v3 = vpop.permute.xlu0 %11  }
  0x7d   :  { %15 = vst.msk [vmem:[#allocation0 + $0x1] sm:$0x1] %vm8_vm0, %v12_v3  }
  0x84   :  { %v20_v4 = vld [vmem:[#allocation0] sm:$0x3] }
  0x85   :  { %23 = vst [vmem:[%s43_s1] sm:$0x3] %v20_v4 }

// kernel: binary_dice_loss.1
= control target key start
LH: loop header
LB: loop body
LE: loop exit
PB: predicated region body
PF: predicated region fallthrough
CT: control target
= control target key end

     0   :  { %vm101_vm0 = vcmask 7168   ;;  %v209_v3 = vmov 0.0   ;;  %s297_s0 = inlined_call_operand.vmem [shape: f32[16,128], index: 0, kind: input, shape index: {}]   ;;  %s298_s1 = inlined_call_operand.vmem [shape: f32[16,128], index: 1, kind: input, shape index: {}]   ;;  %s299_s2 = inlined_call_operand.vmem [shape: f32[16,128], index: 2, kind: input, shape index: {}]   ;;  %s300_s4 = inlined_call_operand.vmem [shape: f32[1,16,1], index: 4, kind: output, shape index: {1}]   ;;  %s301_s3 = inlined_call_operand.vmem [shape: f32[1,16,1], index: 3, kind: output, shape index: {0}]  }
   0x1   :  { %v108_v0 = vld [vmem:[%s297_s0] sm:$0xff]  ;;  %104 = vst.msk [vmem:[%s300_s4] sm:$0xff] %vm101_vm0, %v209_v3  ;;  %105 = vst.msk [vmem:[%s300_s4 + $0x8] sm:$0xff] %vm101_vm0, %v209_v3  ;;  %v109_v6 = vld [vmem:[%s297_s0 + $0x8] sm:$0xff] }
   0x2   :  { %v110_v1 = vld [vmem:[%s298_s1] sm:$0xff]  ;;  %v111_v7 = vld [vmem:[%s298_s1 + $0x8] sm:$0xff]  ;;  %102 = vst.msk [vmem:[%s301_s3] sm:$0xff] %vm101_vm0, %v209_v3  ;;  %103 = vst.msk [vmem:[%s301_s3 + $0x8] sm:$0xff] %vm101_vm0, %v209_v3 }
   0x3   :  { %v112_v2 = vld [vmem:[%s299_s2] sm:$0xff]  ;;  %v113_v8 = vld [vmem:[%s299_s2 + $0x8] sm:$0xff] }
   0x4   :  { %v114_v4 = vmul.f32 %v112_v2, %v108_v0  ;;  %v118_v5 = vmul.f32 %v112_v2, %v110_v1  ;;  %v115_v9 = vmul.f32 %v113_v8, %v109_v6  ;;  %v119_v10 = vmul.f32 %v113_v8, %v111_v7 }
   0x6   :  { %v120_v11 = vadd.f32 %v118_v5, %v114_v4  ;;  %v116_v12 = vmul.f32 %v114_v4, %v110_v1  ;;  %v121_v13 = vadd.f32 %v119_v10, %v115_v9  ;;  %v117_v14 = vmul.f32 %v115_v9, %v111_v7 }
   0x8   :  { %140 = vadd.xlane.f32.xlu1 %v120_v11  ;;  %129 = vadd.xlane.f32.xlu0 %v116_v12  ;;  %v138_v15 = vld [vmem:[%s300_s4] sm:$0xff]  ;;  %v139_v21 = vld [vmem:[%s300_s4 + $0x8] sm:$0xff] }
   0x9   :  { %v127_v16 = vld [vmem:[%s301_s3] sm:$0xff]  ;;  %v128_v22 = vld [vmem:[%s301_s3 + $0x8] sm:$0xff] }
   0xc   :  { %142 = vadd.xlane.f32.xlu1 %v121_v13  ;;  %131 = vadd.xlane.f32.xlu0 %v117_v14 }
  0x91   :  { %v141_v17 = vpop.xlane.xlu1 %140  ;;  %v130_v18 = vpop.xlane.xlu0 %129 }
  0x92   :  { %v144_v19 = vadd.f32 %v141_v17, %v138_v15  ;;  %v133_v20 = vadd.f32 %v130_v18, %v127_v16 }
  0x94   :  { %146 = vst.msk [vmem:[%s300_s4] sm:$0xff] %vm101_vm0, %v144_v19  ;;  %136 = vst.msk [vmem:[%s301_s3] sm:$0xff] %vm101_vm0, %v133_v20 }
  0x95   :  { %v143_v23 = vpop.xlane.xlu1 %142  ;;  %v132_v24 = vpop.xlane.xlu0 %131 }
  0x96   :  { %v145_v25 = vadd.f32 %v143_v23, %v139_v21  ;;  %v134_v26 = vadd.f32 %v132_v24, %v128_v22 }
  0x98   :  { %147 = vst.msk [vmem:[%s300_s4 + $0x8] sm:$0xff] %vm101_vm0, %v145_v25  ;;  %137 = vst.msk [vmem:[%s301_s3 + $0x8] sm:$0xff] %vm101_vm0, %v134_v26 }

</bundles_post_ra>
